<compile_context>
chip_gen: v7x
topology: tpu7x:2x2x1
jax: 0.10.0
libtpu: 0.0.40
codegen_flags: <defaults>
</compile_context>

<pallas_src>
import jax
import jax.numpy as jnp
from jax.experimental import pallas as pl
from jax.experimental.pallas import tpu as pltpu


def _link_predictor_kernel(zsrc_ref, zdst_ref, w_ref, b_ref, o_ref):
    # zsrc_ref, zdst_ref : (TM, Cp) lane-packed activation tiles (Cp = pack*C, 128 if C|128)
    # w_ref              : (Cp, pack) block-diagonal weight (resident in VMEM)
    # b_ref              : (1,) bias scalar in SMEM
    # o_ref              : (TM, pack); logical row r*pack + j lands at o_ref[r, j]
    prod = zsrc_ref[...] * zdst_ref[...]                                   # VPU
    acc = jnp.dot(prod, w_ref[...], preferred_element_type=jnp.float32)   # MXU row-reduce
    o_ref[...] = acc + b_ref[0]


def link_predictor_h(z_src, z_dst, weight, bias, *, in_channels, tm=1024,
                     buffer_count=2):
    """Pallas implementation of LinkPredictor_h.forward.

    z_src, z_dst : arrays whose trailing dim is `in_channels` (any leading dims).
    weight       : (1, in_channels)  -- torch Linear(in, 1).weight
    bias         : (1,)              -- torch Linear(in, 1).bias
    tm           : row tile in *packed* rows (multiple of 8; 512-2048 recommended).
    buffer_count : input pipeline depth (use 3 on v5e to cover slower HBM).
    returns      : (N, 1) with N = prod(leading dims)
    """
    C = in_channels
    z_src2 = z_src.reshape(-1, C).astype(jnp.float32)
    z_dst2 = z_dst.reshape(-1, C).astype(jnp.float32)
    n = z_src2.shape[0]

    # Lane packing: put `pack` logical rows side by side along the 128-lane dim.
    pack = 128 // C if (C <= 128 and 128 % C == 0) else 1
    cp = pack * C

    # Packed-row tile: big by default, shrunk for tiny inputs, multiple of 8 sublanes.
    np_needed = pl.cdiv(n, pack)
    tm_p = min(int(tm), max(8, ((np_needed + 7) // 8) * 8))
    tm_p = ((tm_p + 7) // 8) * 8

    # Tail handling: zero-pad rows up to a whole number of blocks (padded rows are
    # computed but sliced off; they only ever see zero activations).
    rows_per_block = tm_p * pack
    n_pad = ((n + rows_per_block - 1) // rows_per_block) * rows_per_block
    if n_pad != n:
        z_src2 = jnp.pad(z_src2, ((0, n_pad - n), (0, 0)))
        z_dst2 = jnp.pad(z_dst2, ((0, n_pad - n), (0, 0)))

    np_rows = n_pad // pack
    zsrc_p = z_src2.reshape(np_rows, cp)   # free, contiguous reshape -> lane packing
    zdst_p = z_dst2.reshape(np_rows, cp)

    # Block-diagonal weight (cp, pack): column j carries w over rows [j*C, (j+1)*C),
    # so one MXU dot reduces each packed logical row independently.
    w_flat = weight.reshape(C).astype(jnp.float32)
    eye = jnp.eye(pack, dtype=jnp.float32)
    w_mat = (eye[:, None, :] * w_flat[None, :, None]).reshape(cp, pack)

    b_smem = bias.reshape(1).astype(jnp.float32)

    def tile_spec():
        if buffer_count == 2:
            return pl.BlockSpec((tm_p, cp), lambda i: (i, 0))
        # Deeper pipelining (e.g. 3) helps keep v5e's slower HBM pipe saturated.
        return pl.BlockSpec((tm_p, cp), lambda i: (i, 0),
                            pipeline_mode=pl.Buffered(buffer_count))

    grid = (np_rows // tm_p,)
    out_p = pl.pallas_call(
        _link_predictor_kernel,
        out_shape=jax.ShapeDtypeStruct((np_rows, pack), jnp.float32),
        grid_spec=pltpu.PrefetchScalarGridSpec(
            num_scalar_prefetch=0,
            grid=grid,
            in_specs=[
                tile_spec(),                                        # z_src tile
                tile_spec(),                                        # z_dst tile
                pl.BlockSpec((cp, pack), lambda i: (0, 0)),         # weight (resident)
                pl.BlockSpec(memory_space=pltpu.MemorySpace.SMEM),  # bias scalar
            ],
            out_specs=pl.BlockSpec((tm_p, pack), lambda i: (i, 0)),
        ),
        compiler_params=pltpu.CompilerParams(
            dimension_semantics=("parallel",),   # megacore sharding across the grid
        ),
    )(zsrc_p, zdst_p, w_mat, b_smem)

    # Unpack: out_p[r, j] is the score of logical row r*pack + j.
    return out_p.reshape(n_pad, 1)[:n]


if __name__ == "__main__":
    in_channels = 32
    batch, nodes = 2, 8            # leading dims flatten -> N = 16 rows

    key = jax.random.PRNGKey(0)
    k_src, k_dst, k_w, k_b = jax.random.split(key, 4)

    z_src = jax.random.normal(k_src, (batch, nodes, in_channels), dtype=jnp.float32)
    z_dst = jax.random.normal(k_dst, (batch, nodes, in_channels), dtype=jnp.float32)

    # Deterministic Linear(in_channels, 1) params, torch-style uniform(-1/sqrt(C), 1/sqrt(C))
    bound = 1.0 / (in_channels ** 0.5)
    weight = jax.random.uniform(k_w, (1, in_channels), minval=-bound, maxval=bound,
                                dtype=jnp.float32)
    bias = jax.random.uniform(k_b, (1,), minval=-bound, maxval=bound, dtype=jnp.float32)

    out = link_predictor_h(z_src, z_dst, weight, bias, in_channels=in_channels)
    out = jax.block_until_ready(out)

    # Pure-JAX reference of the exact torch semantics (exact f32 multiply + row sum).
    h = (z_src * z_dst).reshape(-1, in_channels)
    ref = jnp.sum(h * weight.reshape(1, in_channels), axis=-1, keepdims=True) + bias

    assert out.shape == (batch * nodes, 1)
    assert jnp.allclose(out, ref, atol=1e-4, rtol=1e-4)

    print("KERNEL_OK")
</pallas_src>

<mosaic_0001>
module attributes {stable_mosaic.version = 11 : i64} {
  func.func @_link_predictor_kernel(%arg0: i32, %arg1: memref<8x128xf32, #tpu.memory_space<vmem>>, %arg2: memref<8x128xf32, #tpu.memory_space<vmem>>, %arg3: memref<128x4xf32, #tpu.memory_space<vmem>>, %arg4: memref<1xf32, #tpu.memory_space<smem>>, %arg5: memref<8x4xf32, #tpu.memory_space<vmem>>) attributes {dimension_semantics = [#tpu.dimension_semantics<parallel>], iteration_bounds = array<i64: 1>, scalar_prefetch = 0 : i64, scratch_operands = 0 : i64, tpu.core_type = #tpu.core_type<tc>, window_params = [{transform_indices = @transform_0, window_bounds = array<i64: 8, 128>}, {transform_indices = @transform_1, window_bounds = array<i64: 8, 128>}, {pipeline_mode = #tpu.pipeline_mode<synchronous>, transform_indices = @transform_2, window_bounds = array<i64: 128, 4>}, {transform_indices = @transform_3, window_bounds = array<i64: 1>}, {transform_indices = @transform_4, window_bounds = array<i64: 8, 4>}]} {
    %c0 = arith.constant 0 : index
    %c0_0 = arith.constant 0 : index
    %0 = vector.load %arg1[%c0, %c0_0] : memref<8x128xf32, #tpu.memory_space<vmem>>, vector<8x128xf32>
    %c0_1 = arith.constant 0 : index
    %c0_2 = arith.constant 0 : index
    %1 = vector.load %arg2[%c0_1, %c0_2] : memref<8x128xf32, #tpu.memory_space<vmem>>, vector<8x128xf32>
    %2 = arith.mulf %0, %1 : vector<8x128xf32>
    %c0_3 = arith.constant 0 : index
    %c0_4 = arith.constant 0 : index
    %3 = vector.load %arg3[%c0_3, %c0_4] : memref<128x4xf32, #tpu.memory_space<vmem>>, vector<128x4xf32>
    %cst = arith.constant dense<0.000000e+00> : vector<8x4xf32>
    %4 = tpu.matmul %2, %3, %cst {dimension_numbers = #tpu.dot_dimension_numbers<[1], [0], [0], [1], [0, 0, 1, 1], [], []>} : vector<8x128xf32>, vector<128x4xf32>, vector<8x4xf32> -> vector<8x4xf32>
    %c0_5 = arith.constant 0 : index
    %5 = memref.load %arg4[%c0_5] : memref<1xf32, #tpu.memory_space<smem>>
    %6 = vector.broadcast %5 : f32 to vector<8x4xf32>
    %7 = arith.addf %4, %6 : vector<8x4xf32>
    %c0_6 = arith.constant 0 : index
    %c0_7 = arith.constant 0 : index
    %8 = vector.load %arg5[%c0_6, %c0_7] : memref<8x4xf32, #tpu.memory_space<vmem>>, vector<8x4xf32>
    tpu.vector_store %arg5[%c0_6, %c0_7], %7 {strides = array<i32>} : memref<8x4xf32, #tpu.memory_space<vmem>>, vector<8x4xf32>,
    return
  }
  func.func @transform_0(%arg0: i32) -> (i32, i32) {
    %c0_i32 = arith.constant 0 : i32
    %c0_i32_0 = arith.constant 0 : i32
    return %arg0, %c0_i32 : i32, i32
  }
  func.func @transform_1(%arg0: i32) -> (i32, i32) {
    %c0_i32 = arith.constant 0 : i32
    %c0_i32_0 = arith.constant 0 : i32
    return %arg0, %c0_i32 : i32, i32
  }
  func.func @transform_2(%arg0: i32) -> (i32, i32) {
    %c0_i32 = arith.constant 0 : i32
    %c0_i32_0 = arith.constant 0 : i32
    %c0_i32_1 = arith.constant 0 : i32
    return %c0_i32, %c0_i32_0 : i32, i32
  }
  func.func @transform_3(%arg0: i32) -> i32 {
    %c0_i32 = arith.constant 0 : i32
    %c0_i32_0 = arith.constant 0 : i32
    return %c0_i32 : i32
  }
  func.func @transform_4(%arg0: i32) -> (i32, i32) {
    %c0_i32 = arith.constant 0 : i32
    %c0_i32_0 = arith.constant 0 : i32
    return %arg0, %c0_i32 : i32, i32
  }
}

</mosaic_0001>

<bundles_post_ra>
// kernel: tpu_custom_call.1
= control target key start
LH: loop header
LB: loop body
LE: loop exit
PB: predicated region body
PF: predicated region fallthrough
CT: control target
= control target key end

     0   :  { %v194_v0 = vmov 0.0|0.0   ;;  %vm195_vm0 = vmmov 0   ;;  %v196_v4 = vmov 0.0   ;;  %vm109_vm1 = vcmask 31744   ;;  %s282_s2 = inlined_call_operand.vmem [shape: f32[128,4], index: 2, kind: input, shape index: {}]   ;;  %s283_s0 = inlined_call_operand.vmem [shape: f32[8,128], index: 0, kind: input, shape index: {}]   ;;  %s284_s1 = inlined_call_operand.vmem [shape: f32[8,128], index: 1, kind: input, shape index: {}]   ;;  %s285_s3 = inlined_call_operand.<no memory space> [shape: f32[1], index: 3, kind: input, shape index: {}]   ;;  %s286_s4 = inlined_call_operand.vmem [shape: f32[8,4], index: 4, kind: output, shape index: {}]  }
   0x1   :  { %167 = vmatprep.subr.bf16.mxu0 %v194_v0  ;;  %v21_v1 = vld [vmem:[%s282_s2] sm:$0xff]  ;;  %v22_v2 = vld [vmem:[%s282_s2 + $0x8] sm:$0xff]  ;;  %v23_v3 = vld [vmem:[%s282_s2 + $0x10] sm:$0xff]  ;;  %164 = vmatprep.mubr.msk.f32.mxu0 %vm195_vm0, %v196_v4  ;;  %v38_v29 = vstv %s285_s3 }
   0x2   :  { %v168_v5 = vpack.c.bf16 %v22_v2, %v21_v1  ;;  %v24_v6 = vld [vmem:[%s282_s2 + $0x18] sm:$0xff]  ;;  %v25_v8 = vld [vmem:[%s282_s2 + $0x20] sm:$0xff]  ;;  %v26_v9 = vld [vmem:[%s282_s2 + $0x28] sm:$0xff] }
   0x3   :  { %v171_v7 = vpack.c.bf16 %v24_v6, %v23_v3  ;;  %v174_v10 = vpack.c.bf16 %v26_v9, %v25_v8  ;;  %v27_v11 = vld [vmem:[%s282_s2 + $0x30] sm:$0xff]  ;;  %v28_v12 = vld [vmem:[%s282_s2 + $0x38] sm:$0xff]  ;;  %v29_v14 = vld [vmem:[%s282_s2 + $0x40] sm:$0xff] }
   0x4   :  { %169 = vmatpush3.bf16.msra.mxu0 %v168_v5  ;;  %v177_v13 = vpack.c.bf16 %v28_v12, %v27_v11  ;;  %v30_v15 = vld [vmem:[%s282_s2 + $0x48] sm:$0xff]  ;;  %v31_v17 = vld [vmem:[%s282_s2 + $0x50] sm:$0xff]  ;;  %v32_v18 = vld [vmem:[%s282_s2 + $0x58] sm:$0xff] }
   0x5   :  { %170 = vmatprep.subr.bf16.mxu0 %v194_v0  ;;  %v180_v16 = vpack.c.bf16 %v30_v15, %v29_v14  ;;  %v183_v19 = vpack.c.bf16 %v32_v18, %v31_v17  ;;  %v33_v20 = vld [vmem:[%s282_s2 + $0x60] sm:$0xff]  ;;  %v34_v21 = vld [vmem:[%s282_s2 + $0x68] sm:$0xff]  ;;  %v35_v23 = vld [vmem:[%s282_s2 + $0x70] sm:$0xff] }
   0x6   :  { %v186_v22 = vpack.c.bf16 %v34_v21, %v33_v20  ;;  %v36_v24 = vld [vmem:[%s282_s2 + $0x78] sm:$0xff]  ;;  %v18_v26 = vld [vmem:[%s283_s0] sm:$0xff] }
   0x7   :  { %v189_v25 = vpack.c.bf16 %v36_v24, %v35_v23  ;;  %v19_v27 = vld [vmem:[%s284_s1] sm:$0xff] }
   0x8   :  { %172 = vmatpush3.bf16.msra.mxu0 %v171_v7  ;;  %v20_v28 = vmul.f32 %v19_v27, %v18_v26 }
   0x9   :  { %173 = vmatprep.subr.bf16.mxu0 %v194_v0 }
   0xc   :  { %175 = vmatpush3.bf16.msra.mxu0 %v174_v10 }
   0xd   :  { %176 = vmatprep.subr.bf16.mxu0 %v194_v0 }
  0x10   :  { %178 = vmatpush3.bf16.msra.mxu0 %v177_v13 }
  0x11   :  { %179 = vmatprep.subr.bf16.mxu0 %v194_v0 }
  0x14   :  { %181 = vmatpush3.bf16.msra.mxu0 %v180_v16 }
  0x15   :  { %182 = vmatprep.subr.bf16.mxu0 %v194_v0 }
  0x18   :  { %184 = vmatpush3.bf16.msra.mxu0 %v183_v19 }
  0x19   :  { %185 = vmatprep.subr.bf16.mxu0 %v194_v0 }
  0x1c   :  { %187 = vmatpush3.bf16.msra.mxu0 %v186_v22 }
  0x1d   :  { %188 = vmatprep.subr.bf16.mxu0 %v194_v0 }
  0x20   :  { %190 = vmatpush3.bf16.msra.mxu0 %v189_v25 }
  0x23   :  { %165 = vmatmul.mubr.f32.vlgmr.msra.gmra.mrb[0].mxu0 %v20_v28 }
  0xf6   :  { %v105_v30 = vpop.f32.mrb[0].mxu0 }
  0xf7   :  { %v106_v31 = vadd.f32 %v105_v30, %v38_v29  ;;  %v166_v32 = vpop.f32.mrb[1].mxu0 }
  0xf9   :  { %110 = vst.msk [vmem:[%s286_s4] sm:$0xff] %vm109_vm1, %v106_v31 }

</bundles_post_ra>
